<compile_context>
chip_gen: v5e
topology: v5e:2x2
jax: 0.10.0
libtpu: 0.0.40
codegen_flags: <defaults>
</compile_context>

<pallas_src>
import math

import jax
import jax.numpy as jnp
import numpy as np
from jax.experimental import pallas as pl
from jax.experimental.pallas import tpu as pltpu

# ----------------------------- configuration -------------------------------
# Small shapes consistent with the module (real defaults are 512/512/18;
# feature dims shrunk to 128, n_layer kept at 18 as in the PyTorch forward).
EMBED_DIM = 128
LATENT_DIM = 128
N_LAYER = 18
BATCH = 2


# ------------------------------ Pallas kernel -------------------------------
def _upscale_kernel(x_ref, w_ref, b_ref, o_ref):
    # x: (B, E) bf16   w: (E, T) bf16   b: (1, T) f32   o: (B, T) f32
    acc = jnp.dot(x_ref[...], w_ref[...], preferred_element_type=jnp.float32)
    o_ref[...] = (acc + b_ref[...]).astype(o_ref.dtype)


def upscale_embed(x, w_eff, b_eff, *, n_layer=N_LAYER, latent_dim=LATENT_DIM,
                  n_col_blocks=1, core_split=False):
    """UpScaleEmbed.forward: (B, E) -> (B, n_layer, latent_dim).

    w_eff: (E, n_layer*latent_dim) effective weight (equalized-lr scale folded,
           typically bf16)
    b_eff: (n_layer*latent_dim,)   effective bias (lr_mul folded, f32)

    n_col_blocks: number of output-column tiles.  Keep 1 on single-TC
        v5e/v6e at small configs; raise it (and/or use bf16) at the real
        512x9216 config so double-buffered tiles fit scoped VMEM.
    core_split:   set True on v7x (with n_col_blocks a multiple of the TC
        count) to split the column axis across TensorCores via CORE_PARALLEL.
    """
    B, E = x.shape
    out_dim = n_layer * latent_dim
    assert w_eff.shape == (E, out_dim)
    assert out_dim % n_col_blocks == 0
    tile = out_dim // n_col_blocks
    assert tile % 128 == 0, "output tile must stay lane-dense"

    # Stream activations at the weight dtype (bf16); accumulate in f32.
    x = x.astype(w_eff.dtype)
    b2 = b_eff.reshape(1, out_dim).astype(jnp.float32)

    w_isz = w_eff.dtype.itemsize
    x_isz = x.dtype.itemsize
    # Double-buffered per-tile working set + resident activations (+ headroom).
    needed = (2 * (E * tile * w_isz + tile * 4 + B * tile * 4)
              + 2 * B * E * x_isz)
    vmem_limit = int(min(max(2 * needed + (4 << 20), 16 << 20), 48 << 20))

    cost = pl.CostEstimate(
        flops=2 * B * E * out_dim,
        transcendentals=0,
        bytes_accessed=(B * E * x_isz + E * out_dim * w_isz
                        + out_dim * 4 + B * out_dim * 4),
    )

    semantics = (pltpu.CORE_PARALLEL if core_split else "arbitrary",)

    out = pl.pallas_call(
        _upscale_kernel,
        out_shape=jax.ShapeDtypeStruct((B, out_dim), jnp.float32),
        grid=(n_col_blocks,),
        in_specs=[
            pl.BlockSpec((B, E), lambda j: (0, 0)),       # activations (tiny)
            pl.BlockSpec((E, tile), lambda j: (0, j)),    # weight column tile
            pl.BlockSpec((1, tile), lambda j: (0, j)),    # bias column tile
        ],
        out_specs=pl.BlockSpec((B, tile), lambda j: (0, j)),
        compiler_params=pltpu.CompilerParams(
            dimension_semantics=semantics,
            vmem_limit_bytes=vmem_limit,
        ),
        cost_estimate=cost,
    )(x, w_eff, b2)
    # view(-1, n_layer, latent_dim): metadata-only reshape, no data movement.
    return out.reshape(-1, n_layer, latent_dim)


# ------------------------------ param handling ------------------------------
def init_params(key):
    """PyTorch-style raw EqualLinear parameters.

    weight: randn(out_dim, in_dim) / lr_mul   (lr_mul = 1 here)
    bias:   (out_dim,)  (PyTorch inits to 0; small random so the bias path is
            actually exercised by the test)
    """
    kw, kb = jax.random.split(key)
    w_param = jax.random.normal(kw, (N_LAYER * LATENT_DIM, EMBED_DIM),
                                jnp.float32)
    b_param = 0.1 * jax.random.normal(kb, (N_LAYER * LATENT_DIM,), jnp.float32)
    return w_param, b_param


def prepare_params(w_param, b_param, lr_mul=1.0, weight_dtype=jnp.bfloat16):
    """Fold equalized-lr scaling once (outside the hot path):
        W_eff = (W_param * (1/sqrt(in_dim)) * lr_mul)^T  -> (E, out_dim), bf16
        b_eff = b_param * lr_mul                          -> (out_dim,),   f32
    """
    in_dim = w_param.shape[1]                      # do NOT hardcode EMBED_DIM
    scale = (1.0 / math.sqrt(in_dim)) * lr_mul
    w_eff = jnp.asarray((w_param * scale).T, dtype=weight_dtype)
    b_eff = jnp.asarray(b_param * lr_mul, dtype=jnp.float32)
    return w_eff, b_eff


# --------------------------- references (numpy f64) --------------------------
def ref_from_effective(x_bf16, w_eff, b_eff, n_layer=N_LAYER,
                       latent_dim=LATENT_DIM):
    """f64 reference on the SAME bf16-quantized operands the kernel consumes."""
    x64 = np.asarray(jnp.asarray(x_bf16, jnp.float32), np.float64)
    w64 = np.asarray(jnp.asarray(w_eff, jnp.float32), np.float64)
    b64 = np.asarray(b_eff, np.float64)
    out = x64 @ w64 + b64
    return out.reshape(-1, n_layer, latent_dim)


def ref_upscale_embed(x, w_param, b_param, lr_mul=1.0):
    """Full-precision PyTorch-semantics reference (no bf16 quantization)."""
    x = np.asarray(x, np.float64)
    w = np.asarray(w_param, np.float64)
    b = np.asarray(b_param, np.float64)
    in_dim = w.shape[1]
    scale = (1.0 / math.sqrt(in_dim)) * lr_mul
    out = x @ (w * scale).T + b * lr_mul
    return out.reshape(-1, N_LAYER, LATENT_DIM)


# --------------------------------- main -------------------------------------
if __name__ == "__main__":
    key = jax.random.PRNGKey(0)
    pkey, xkey = jax.random.split(key)

    w_param, b_param = init_params(pkey)
    w_eff, b_eff = prepare_params(w_param, b_param)     # bf16 weight, f32 bias
    x_f32 = jax.random.normal(xkey, (BATCH, EMBED_DIM), jnp.float32)

    # Default config: single launch, single full-width block (best on v5e/v6e;
    # runs clean on any generation).
    fn = jax.jit(upscale_embed)
    out = jax.block_until_ready(fn(x_f32, w_eff, b_eff))
    assert out.shape == (BATCH, N_LAYER, LATENT_DIM), out.shape

    # Tight check vs f64 reference on the same bf16-quantized operands
    # (kernel accumulates in f32).
    ref_q = ref_from_effective(x_f32.astype(jnp.bfloat16), w_eff, b_eff)
    np.testing.assert_allclose(np.asarray(out, np.float64), ref_q,
                               rtol=1e-4, atol=1e-4)

    # Loose check vs the full-precision PyTorch-semantics reference
    # (bf16 weight/activation quantization is the only difference).
    ref_full = ref_upscale_embed(np.asarray(x_f32), w_param, b_param)
    np.testing.assert_allclose(np.asarray(out, np.float64), ref_full,
                               rtol=5e-2, atol=5e-2)

    # Column-tiled path (what the real 512x9216 config / a v7x core split
    # would use).  Splitting only the N axis leaves per-element accumulation
    # order unchanged, so results match the single-block run.
    fn2 = jax.jit(lambda a, w, b: upscale_embed(a, w, b, n_col_blocks=2))
    out2 = jax.block_until_ready(fn2(x_f32, w_eff, b_eff))
    np.testing.assert_allclose(np.asarray(out2), np.asarray(out),
                               rtol=1e-6, atol=1e-6)

    print("KERNEL_OK")
</pallas_src>

<mosaic_0001>
module attributes {stable_mosaic.version = 11 : i64} {
  func.func @_upscale_kernel(%arg0: i32, %arg1: memref<2x128xbf16, #tpu.memory_space<vmem>>, %arg2: memref<128x2304xbf16, #tpu.memory_space<vmem>>, %arg3: memref<1x2304xf32, #tpu.memory_space<vmem>>, %arg4: memref<2x2304xf32, #tpu.memory_space<vmem>>) attributes {dimension_semantics = [#tpu.dimension_semantics<arbitrary>], iteration_bounds = array<i64: 1>, scalar_prefetch = 0 : i64, scratch_operands = 0 : i64, tpu.core_type = #tpu.core_type<tc>, window_params = [{pipeline_mode = #tpu.pipeline_mode<synchronous>, transform_indices = @transform_0, window_bounds = array<i64: 2, 128>}, {transform_indices = @transform_1, window_bounds = array<i64: 128, 2304>}, {transform_indices = @transform_2, window_bounds = array<i64: 1, 2304>}, {transform_indices = @transform_3, window_bounds = array<i64: 2, 2304>}]} {
    %c0 = arith.constant 0 : index
    %c0_0 = arith.constant 0 : index
    %0 = vector.load %arg1[%c0, %c0_0] : memref<2x128xbf16, #tpu.memory_space<vmem>>, vector<2x128xbf16>
    %c0_1 = arith.constant 0 : index
    %c0_2 = arith.constant 0 : index
    %1 = vector.load %arg2[%c0_1, %c0_2] : memref<128x2304xbf16, #tpu.memory_space<vmem>>, vector<128x2304xbf16>
    %cst = arith.constant dense<0.000000e+00> : vector<2x2304xf32>
    %2 = tpu.matmul %0, %1, %cst {dimension_numbers = #tpu.dot_dimension_numbers<[1], [0], [0], [1], [0, 0, 1, 1], [], []>} : vector<2x128xbf16>, vector<128x2304xbf16>, vector<2x2304xf32> -> vector<2x2304xf32>
    %c0_3 = arith.constant 0 : index
    %c0_4 = arith.constant 0 : index
    %3 = vector.load %arg3[%c0_3, %c0_4] : memref<1x2304xf32, #tpu.memory_space<vmem>>, vector<1x2304xf32>
    %4 = vector.broadcast %3 : vector<1x2304xf32> to vector<2x2304xf32>
    %5 = arith.addf %2, %4 : vector<2x2304xf32>
    %c0_5 = arith.constant 0 : index
    %c0_6 = arith.constant 0 : index
    %6 = vector.load %arg4[%c0_5, %c0_6] : memref<2x2304xf32, #tpu.memory_space<vmem>>, vector<2x2304xf32>
    tpu.vector_store %arg4[%c0_5, %c0_6], %5 {strides = array<i32>} : memref<2x2304xf32, #tpu.memory_space<vmem>>, vector<2x2304xf32>,
    return
  }
  func.func @transform_0(%arg0: i32) -> (i32, i32) {
    %c0_i32 = arith.constant 0 : i32
    %c0_i32_0 = arith.constant 0 : i32
    %c0_i32_1 = arith.constant 0 : i32
    return %c0_i32, %c0_i32_0 : i32, i32
  }
  func.func @transform_1(%arg0: i32) -> (i32, i32) {
    %c0_i32 = arith.constant 0 : i32
    %c0_i32_0 = arith.constant 0 : i32
    return %c0_i32, %arg0 : i32, i32
  }
  func.func @transform_2(%arg0: i32) -> (i32, i32) {
    %c0_i32 = arith.constant 0 : i32
    %c0_i32_0 = arith.constant 0 : i32
    return %c0_i32, %arg0 : i32, i32
  }
  func.func @transform_3(%arg0: i32) -> (i32, i32) {
    %c0_i32 = arith.constant 0 : i32
    %c0_i32_0 = arith.constant 0 : i32
    return %c0_i32, %arg0 : i32, i32
  }
}

</mosaic_0001>

<bundles_post_ra>
// kernel: upscale_embed.1
= control target key start
LH: loop header
LB: loop body
LE: loop exit
PB: predicated region body
PF: predicated region fallthrough
CT: control target
= control target key end

     0   :  { %8 = vsyncpa [#allocation3], 0  ;;  %s2097_s0 = inlined_call_operand.vmem [shape: bf16[2,128], index: 0, kind: input, shape index: {}]   ;;  %s2098_s1 = inlined_call_operand.hbm [shape: bf16[128,2304], index: 1, kind: input, shape index: {}]   ;;  %s2099_s2 = inlined_call_operand.vmem [shape: f32[1,2304], index: 2, kind: input, shape index: {}]   ;;  %s2100_s3 = inlined_call_operand.hbm [shape: f32[2,2304], index: 3, kind: output, shape index: {}]  }
   0x1   :  { %9 = vsyncpa [#allocation4], 0  ;;  %s16_s14 = sshll.u32 %s2098_s1, 4  ;;  %s2022_s15 = smov [#allocation2]   ;;  %s17_s14 = int_to_ptr.hbm [resolvable:$true] %s16_s14 }
   0x2   :  { %s18_s16 = sshll.u32 %s2022_s15, 4  ;;  %s2023_s17 = smov 1152   ;;  %s19_s16 = int_to_ptr.vmem [resolvable:$true] %s18_s16 }
   0x3   :  { %s2024_s18 = smov 72  }
   0x4   :  { %24 = dma.hbm_to_vmem [thread:$0]  %s17_s14, 18432, %s19_s16, [#allocation3], %s2023_s17, %s2023_s17, %s2024_s18  }
   0x5   :  { %2018 = dma.done.wait [#allocation3], 18432  }
   0x6   :  { %2019 = vsyncadd [#allocation3], 4294948864  ;;  %v1752_v0 = vld [vmem:[#allocation2 + $0x3f0] sm:$0xf]  ;;  %v1957_v1 = vld [vmem:[#allocation2 + $0x434] sm:$0xf0] }
   0x7   :  { %v1948_v2 = vld [vmem:[#allocation2 + $0x3f4] sm:$0xf]  ;;  %v1753_v3 = vor.u32 %v1957_v1, %v1752_v0  ;;  %v1754_v4 = vld [vmem:[#allocation2 + $0x438] sm:$0xf0]  ;;  %v1680_v5 = vld [vmem:[#allocation2 + $0x360] sm:$0xf] }
   0x8   :  { %v1939_v6 = vld [vmem:[#allocation2 + $0x3a4] sm:$0xf0]  ;;  %v1757_v7 = vor.u32 %v1948_v2, %v1754_v4  ;;  %v1930_v8 = vld [vmem:[#allocation2 + $0x364] sm:$0xf]  ;;  %v1682_v9 = vld [vmem:[#allocation2 + $0x3a8] sm:$0xf0] }
   0x9   :  { %v1760_v10 = vld [vmem:[#allocation2 + $0x3f8] sm:$0xf]  ;;  %938 = vmatpush.bf16.msra.mxu0 %v1753_v3  ;;  %v1681_v11 = vor.u32 %v1939_v6, %v1680_v5  ;;  %v1958_v12 = vld [vmem:[#allocation2 + $0x43c] sm:$0xf0]  ;;  %v1949_v13 = vld [vmem:[#allocation2 + $0x3fc] sm:$0xf]  ;;  %v1685_v15 = vor.u32 %v1930_v8, %v1682_v9 }
   0xa   :  { %v1762_v14 = vld [vmem:[#allocation2 + $0x440] sm:$0xf0]  ;;  %951 = vmatpush.bf16.msra.mxu1 %v1757_v7  ;;  %v1761_v16 = vor.u32 %v1958_v12, %v1760_v10  ;;  %v1608_v18 = vld [vmem:[#allocation2 + $0x2d0] sm:$0xf]  ;;  %v1921_v19 = vld [vmem:[#allocation2 + $0x314] sm:$0xf0] }
   0xb   :  { %v1765_v17 = vor.u32 %v1949_v13, %v1762_v14  ;;  %v1912_v20 = vld [vmem:[#allocation2 + $0x2d4] sm:$0xf]  ;;  %v1610_v21 = vld [vmem:[#allocation2 + $0x318] sm:$0xf0]  ;;  %v1688_v22 = vld [vmem:[#allocation2 + $0x368] sm:$0xf]  ;;  %v1609_v27 = vor.u32 %v1921_v19, %v1608_v18 }
   0xc   :  { %v1940_v23 = vld [vmem:[#allocation2 + $0x3ac] sm:$0xf0]  ;;  %964 = vmatpush.bf16.msra.mxu2 %v1761_v16  ;;  %v1931_v25 = vld [vmem:[#allocation2 + $0x36c] sm:$0xf]  ;;  %v1690_v26 = vld [vmem:[#allocation2 + $0x3b0] sm:$0xf0]  ;;  %v1613_v31 = vor.u32 %v1912_v20, %v1610_v21 }
   0xd   :  { %977 = vmatpush.bf16.msra.mxu3 %v1765_v17  ;;  %v1689_v24 = vor.u32 %v1940_v23, %v1688_v22  ;;  %939 = vmatpush.bf16.msra.mxu0 %v1681_v11  ;;  %v1693_v28 = vor.u32 %v1931_v25, %v1690_v26  ;;  %v1536_v29 = vld [vmem:[#allocation2 + $0x240] sm:$0xf]  ;;  %v1903_v30 = vld [vmem:[#allocation2 + $0x284] sm:$0xf0]  ;;  %v1616_v32 = vld [vmem:[#allocation2 + $0x2d8] sm:$0xf] }
   0xe   :  { %952 = vmatpush.bf16.msra.mxu1 %v1685_v15  ;;  %v1922_v33 = vld [vmem:[#allocation2 + $0x31c] sm:$0xf0]  ;;  %v1913_v34 = vld [vmem:[#allocation2 + $0x2dc] sm:$0xf]  ;;  %v1894_v35 = vld [vmem:[#allocation2 + $0x244] sm:$0xf]  ;;  %v1537_v41 = vor.u32 %v1903_v30, %v1536_v29 }
   0xf   :  { %v1538_v36 = vld [vmem:[#allocation2 + $0x288] sm:$0xf0]  ;;  %v1618_v37 = vld [vmem:[#allocation2 + $0x320] sm:$0xf0]  ;;  %v1617_v38 = vor.u32 %v1922_v33, %v1616_v32  ;;  %v1544_v40 = vld [vmem:[#allocation2 + $0x248] sm:$0xf] }
  0x10   :  { %965 = vmatpush.bf16.msra.mxu2 %v1689_v24  ;;  %v1621_v39 = vor.u32 %v1913_v34, %v1618_v37  ;;  %v1904_v42 = vld [vmem:[#allocation2 + $0x28c] sm:$0xf0]  ;;  %v1895_v43 = vld [vmem:[#allocation2 + $0x24c] sm:$0xf]  ;;  %v1546_v44 = vld [vmem:[#allocation2 + $0x290] sm:$0xf0]  ;;  %v1541_v45 = vor.u32 %v1894_v35, %v1538_v36 }
  0x11   :  { %978 = vmatpush.bf16.msra.mxu3 %v1693_v28  ;;  %940 = vmatpush.bf16.msra.mxu0 %v1609_v27  ;;  %v1464_v46 = vld [vmem:[#allocation2 + $0x1b0] sm:$0xf]  ;;  %v1885_v47 = vld [vmem:[#allocation2 + $0x1f4] sm:$0xf0]  ;;  %v1876_v48 = vld [vmem:[#allocation2 + $0x1b4] sm:$0xf]  ;;  %v1545_v50 = vor.u32 %v1904_v42, %v1544_v40  ;;  %v1549_v51 = vor.u32 %v1895_v43, %v1546_v44 }
  0x12   :  { %953 = vmatpush.bf16.msra.mxu1 %v1613_v31  ;;  %v1466_v49 = vld [vmem:[#allocation2 + $0x1f8] sm:$0xf0]  ;;  %v1472_v52 = vld [vmem:[#allocation2 + $0x1b8] sm:$0xf]  ;;  %v1465_v53 = vor.u32 %v1885_v47, %v1464_v46  ;;  %v1886_v54 = vld [vmem:[#allocation2 + $0x1fc] sm:$0xf0] }
  0x13   :  { %v1877_v55 = vld [vmem:[#allocation2 + $0x1bc] sm:$0xf]  ;;  %v1474_v56 = vld [vmem:[#allocation2 + $0x200] sm:$0xf0]  ;;  %v1469_v57 = vor.u32 %v1876_v48, %v1466_v49  ;;  %v1392_v58 = vld [vmem:[#allocation2 + $0x120] sm:$0xf]  ;;  %v1473_v62 = vor.u32 %v1886_v54, %v1472_v52 }
  0x14   :  { %966 = vmatpush.bf16.msra.mxu2 %v1617_v38  ;;  %v1867_v59 = vld [vmem:[#allocation2 + $0x164] sm:$0xf0]  ;;  %v1858_v60 = vld [vmem:[#allocation2 + $0x124] sm:$0xf]  ;;  %v1394_v61 = vld [vmem:[#allocation2 + $0x168] sm:$0xf0]  ;;  %v1477_v63 = vor.u32 %v1877_v55, %v1474_v56 }
  0x15   :  { %979 = vmatpush.bf16.msra.mxu3 %v1621_v39  ;;  %941 = vmatpush.bf16.msra.mxu0 %v1537_v41  ;;  %v1400_v0 = vld [vmem:[#allocation2 + $0x128] sm:$0xf]  ;;  %v1393_v1 = vor.u32 %v1867_v59, %v1392_v58  ;;  %v1868_v2 = vld [vmem:[#allocation2 + $0x16c] sm:$0xf0]  ;;  %v1859_v3 = vld [vmem:[#allocation2 + $0x12c] sm:$0xf]  ;;  %v1397_v5 = vor.u32 %v1858_v60, %v1394_v61 }
  0x16   :  { %954 = vmatpush.bf16.msra.mxu1 %v1541_v45  ;;  %v1402_v4 = vld [vmem:[#allocation2 + $0x170] sm:$0xf0]  ;;  %v1320_v6 = vld [vmem:[#allocation2 + $0x90] sm:$0xf]  ;;  %v1849_v7 = vld [vmem:[#allocation2 + $0xd4] sm:$0xf0]  ;;  %v1401_v10 = vor.u32 %v1868_v2, %v1400_v0 }
  0x17   :  { %v1840_v8 = vld [vmem:[#allocation2 + $0x94] sm:$0xf]  ;;  %v1322_v9 = vld [vmem:[#allocation2 + $0xd8] sm:$0xf0]  ;;  %v1405_v11 = vor.u32 %v1859_v3, %v1402_v4  ;;  %v1248_v12 = vld [vmem:[#allocation2] sm:$0xf]  ;;  %v1321_v14 = vor.u32 %v1849_v7, %v1320_v6 }
  0x18   :  { %967 = vmatpush.bf16.msra.mxu2 %v1545_v50  ;;  %v1328_v13 = vld [vmem:[#allocation2 + $0x98] sm:$0xf]  ;;  %v1850_v15 = vld [vmem:[#allocation2 + $0xdc] sm:$0xf0]  ;;  %v1841_v16 = vld [vmem:[#allocation2 + $0x9c] sm:$0xf]  ;;  %v1325_v18 = vor.u32 %v1840_v8, %v1322_v9 }
  0x19   :  { %980 = vmatpush.bf16.msra.mxu3 %v1549_v51  ;;  %942 = vmatpush.bf16.msra.mxu0 %v1465_v53  ;;  %v1330_v17 = vld [vmem:[#allocation2 + $0xe0] sm:$0xf0]  ;;  %v1831_v19 = vld [vmem:[#allocation2 + $0x44] sm:$0xf0]  ;;  %v1250_v21 = vld [vmem:[#allocation2 + $0x48] sm:$0xf0]  ;;  %v1329_v25 = vor.u32 %v1850_v15, %v1328_v13 }
  0x1a   :  { %955 = vmatpush.bf16.msra.mxu1 %v1469_v57  ;;  %v1822_v20 = vld [vmem:[#allocation2 + $0x4] sm:$0xf]  ;;  %v1768_v22 = vld [vmem:[#allocation2 + $0x400] sm:$0xf]  ;;  %v1959_v23 = vld [vmem:[#allocation2 + $0x444] sm:$0xf0]  ;;  %v1333_v26 = vor.u32 %v1841_v16, %v1330_v17  ;;  %v1249_v30 = vor.u32 %v1831_v19, %v1248_v12 }
  0x1b   :  { %v1950_v24 = vld [vmem:[#allocation2 + $0x404] sm:$0xf]  ;;  %v1770_v27 = vld [vmem:[#allocation2 + $0x448] sm:$0xf0]  ;;  %v1256_v28 = vld [vmem:[#allocation2 + $0x8] sm:$0xf]  ;;  %v1253_v34 = vor.u32 %v1822_v20, %v1250_v21  ;;  %v1769_v35 = vor.u32 %v1959_v23, %v1768_v22 }
  0x1c   :  { %968 = vmatpush.bf16.msra.mxu2 %v1473_v62  ;;  %v1832_v29 = vld [vmem:[#allocation2 + $0x4c] sm:$0xf0]  ;;  %v1823_v31 = vld [vmem:[#allocation2 + $0xc] sm:$0xf]  ;;  %v1258_v32 = vld [vmem:[#allocation2 + $0x50] sm:$0xf0]  ;;  %v1773_v39 = vor.u32 %v1950_v24, %v1770_v27 }
  0x1d   :  { %981 = vmatpush.bf16.msra.mxu3 %v1477_v63  ;;  %943 = vmatpush.bf16.msra.mxu0 %v1393_v1  ;;  %v1776_v33 = vld [vmem:[#allocation2 + $0x408] sm:$0xf]  ;;  %v1960_v36 = vld [vmem:[#allocation2 + $0x44c] sm:$0xf0]  ;;  %v1951_v37 = vld [vmem:[#allocation2 + $0x40c] sm:$0xf]  ;;  %v1257_v42 = vor.u32 %v1832_v29, %v1256_v28  ;;  %v1261_v43 = vor.u32 %v1823_v31, %v1258_v32 }
  0x1e   :  { %956 = vmatpush.bf16.msra.mxu1 %v1397_v5  ;;  %v1778_v38 = vld [vmem:[#allocation2 + $0x450] sm:$0xf0]  ;;  %v1696_v40 = vld [vmem:[#allocation2 + $0x370] sm:$0xf]  ;;  %v1941_v41 = vld [vmem:[#allocation2 + $0x3b4] sm:$0xf0]  ;;  %v1777_v46 = vor.u32 %v1960_v36, %v1776_v33 }
  0x1f   :  { %v1932_v44 = vld [vmem:[#allocation2 + $0x374] sm:$0xf]  ;;  %v1698_v45 = vld [vmem:[#allocation2 + $0x3b8] sm:$0xf0]  ;;  %v1781_v47 = vor.u32 %v1951_v37, %v1778_v38  ;;  %v1704_v48 = vld [vmem:[#allocation2 + $0x378] sm:$0xf]  ;;  %v1697_v49 = vor.u32 %v1941_v41, %v1696_v40 }
  0x20   :  { %969 = vmatpush.bf16.msra.mxu2 %v1401_v10  ;;  %v1942_v50 = vld [vmem:[#allocation2 + $0x3bc] sm:$0xf0]  ;;  %v1933_v51 = vld [vmem:[#allocation2 + $0x37c] sm:$0xf]  ;;  %v1706_v52 = vld [vmem:[#allocation2 + $0x3c0] sm:$0xf0]  ;;  %v1701_v53 = vor.u32 %v1932_v44, %v1698_v45 }
  0x21   :  { %982 = vmatpush.bf16.msra.mxu3 %v1405_v11  ;;  %944 = vmatpush.bf16.msra.mxu0 %v1321_v14  ;;  %v1624_v54 = vld [vmem:[#allocation2 + $0x2e0] sm:$0xf]  ;;  %v1923_v55 = vld [vmem:[#allocation2 + $0x324] sm:$0xf0]  ;;  %v1914_v56 = vld [vmem:[#allocation2 + $0x2e4] sm:$0xf]  ;;  %v1705_v59 = vor.u32 %v1942_v50, %v1704_v48  ;;  %v1709_v60 = vor.u32 %v1933_v51, %v1706_v52 }
  0x22   :  { %957 = vmatpush.bf16.msra.mxu1 %v1325_v18  ;;  %v1626_v57 = vld [vmem:[#allocation2 + $0x328] sm:$0xf0]  ;;  %v2052_v58 = vld [vmem:[%s2097_s0] sm:$0x1]  ;;  %v1632_v61 = vld [vmem:[#allocation2 + $0x2e8] sm:$0xf]  ;;  %v1625_v62 = vor.u32 %v1923_v55, %v1624_v54 }
  0x23   :  { %v1924_v63 = vld [vmem:[#allocation2 + $0x32c] sm:$0xf0]  ;;  %v1915_v0 = vld [vmem:[#allocation2 + $0x2ec] sm:$0xf]  ;;  %v1634_v1 = vld [vmem:[#allocation2 + $0x330] sm:$0xf0]  ;;  %v1629_v2 = vor.u32 %v1914_v56, %v1626_v57 }
  0x24   :  { %970 = vmatpush.bf16.msra.mxu2 %v1329_v25  ;;  %v1552_v3 = vld [vmem:[#allocation2 + $0x250] sm:$0xf]  ;;  %v1905_v4 = vld [vmem:[#allocation2 + $0x294] sm:$0xf0]  ;;  %v1896_v5 = vld [vmem:[#allocation2 + $0x254] sm:$0xf]  ;;  %v1633_v7 = vor.u32 %v1924_v63, %v1632_v61  ;;  %v1637_v8 = vor.u32 %v1915_v0, %v1634_v1 }
  0x25   :  { %983 = vmatpush.bf16.msra.mxu3 %v1333_v26  ;;  %945 = vmatpush.bf16.msra.mxu0 %v1249_v30  ;;  %v1554_v6 = vld [vmem:[#allocation2 + $0x298] sm:$0xf0]  ;;  %v1560_v9 = vld [vmem:[#allocation2 + $0x258] sm:$0xf]  ;;  %v1553_v10 = vor.u32 %v1905_v4, %v1552_v3  ;;  %v1906_v11 = vld [vmem:[#allocation2 + $0x29c] sm:$0xf0] }
  0x26   :  { %958 = vmatpush.bf16.msra.mxu1 %v1253_v34  ;;  %v1897_v12 = vld [vmem:[#allocation2 + $0x25c] sm:$0xf]  ;;  %v1562_v13 = vld [vmem:[#allocation2 + $0x2a0] sm:$0xf0]  ;;  %v1557_v14 = vor.u32 %v1896_v5, %v1554_v6  ;;  %v1480_v15 = vld [vmem:[#allocation2 + $0x1c0] sm:$0xf]  ;;  %v1561_v19 = vor.u32 %v1906_v11, %v1560_v9 }
  0x27   :  { %v1887_v16 = vld [vmem:[#allocation2 + $0x204] sm:$0xf0]  ;;  %v1878_v17 = vld [vmem:[#allocation2 + $0x1c4] sm:$0xf]  ;;  %v1482_v18 = vld [vmem:[#allocation2 + $0x208] sm:$0xf0]  ;;  %v1565_v20 = vor.u32 %v1897_v12, %v1562_v13 }
  0x28   :  { %971 = vmatpush.bf16.msra.mxu2 %v1257_v42  ;;  %946 = vmatmul.bf16.vlgmr.msra.gmra.mxu0 %v2052_v58  ;;  %v1488_v21 = vld [vmem:[#allocation2 + $0x1c8] sm:$0xf]  ;;  %v1481_v22 = vor.u32 %v1887_v16, %v1480_v15  ;;  %v1888_v23 = vld [vmem:[#allocation2 + $0x20c] sm:$0xf0]  ;;  %v1879_v24 = vld [vmem:[#allocation2 + $0x1cc] sm:$0xf]  ;;  %v1485_v26 = vor.u32 %v1878_v17, %v1482_v18 }
  0x29   :  { %990 = vmatpush.bf16.msrb.mxu0 %v1769_v35  ;;  %984 = vmatpush.bf16.msra.mxu3 %v1261_v43  ;;  %v1490_v25 = vld [vmem:[#allocation2 + $0x210] sm:$0xf0]  ;;  %v1408_v27 = vld [vmem:[#allocation2 + $0x130] sm:$0xf]  ;;  %v1869_v28 = vld [vmem:[#allocation2 + $0x174] sm:$0xf0]  ;;  %v1489_v31 = vor.u32 %v1888_v23, %v1488_v21 }
  0x2a   :  { %1003 = vmatpush.bf16.msrb.mxu1 %v1773_v39  ;;  %v1860_v29 = vld [vmem:[#allocation2 + $0x134] sm:$0xf]  ;;  %v1410_v30 = vld [vmem:[#allocation2 + $0x178] sm:$0xf0]  ;;  %v1493_v32 = vor.u32 %v1879_v24, %v1490_v25  ;;  %v1416_v33 = vld [vmem:[#allocation2 + $0x138] sm:$0xf]  ;;  %v1409_v34 = vor.u32 %v1869_v28, %v1408_v27 }
  0x2b   :  { %959 = vmatmul.bf16.vlgmr.msra.gmra.mxu1 %v2052_v58  ;;  %972 = vmatmul.bf16.vlgmr.msra.gmra.mxu2 %v2052_v58  ;;  %v1870_v35 = vld [vmem:[#allocation2 + $0x17c] sm:$0xf0]  ;;  %v1861_v36 = vld [vmem:[#allocation2 + $0x13c] sm:$0xf]  ;;  %v1418_v37 = vld [vmem:[#allocation2 + $0x180] sm:$0xf0]  ;;  %v1413_v38 = vor.u32 %v1860_v29, %v1410_v30 }
  0x2c   :  { %1016 = vmatpush.bf16.msrb.mxu2 %v1777_v46  ;;  %985 = vmatmul.bf16.vlgmr.msra.gmra.mxu3 %v2052_v58  ;;  %v1336_v39 = vld [vmem:[#allocation2 + $0xa0] sm:$0xf]  ;;  %v1851_v40 = vld [vmem:[#allocation2 + $0xe4] sm:$0xf0]  ;;  %v1842_v41 = vld [vmem:[#allocation2 + $0xa4] sm:$0xf]  ;;  %v1417_v43 = vor.u32 %v1870_v35, %v1416_v33  ;;  %v1421_v44 = vor.u32 %v1861_v36, %v1418_v37 }
  0x2d   :  { %1029 = vmatpush.bf16.msrb.mxu3 %v1781_v47  ;;  %991 = vmatpush.bf16.msrb.mxu0 %v1697_v49  ;;  %v1338_v42 = vld [vmem:[#allocation2 + $0xe8] sm:$0xf0]  ;;  %v1264_v45 = vld [vmem:[#allocation2 + $0x10] sm:$0xf]  ;;  %v1344_v46 = vld [vmem:[#allocation2 + $0xa8] sm:$0xf]  ;;  %v1337_v47 = vor.u32 %v1851_v40, %v1336_v39 }
  0x2e   :  { %1004 = vmatpush.bf16.msrb.mxu1 %v1701_v53  ;;  %v1852_v48 = vld [vmem:[#allocation2 + $0xec] sm:$0xf0]  ;;  %v1843_v49 = vld [vmem:[#allocation2 + $0xac] sm:$0xf]  ;;  %v1346_v50 = vld [vmem:[#allocation2 + $0xf0] sm:$0xf0]  ;;  %v1341_v51 = vor.u32 %v1842_v41, %v1338_v42 }
  0x2f   :  { %v1833_v52 = vld [vmem:[#allocation2 + $0x54] sm:$0xf0]  ;;  %v1824_v53 = vld [vmem:[#allocation2 + $0x14] sm:$0xf]  ;;  %v1266_v54 = vld [vmem:[#allocation2 + $0x58] sm:$0xf0] }
  0x30   :  { %1017 = vmatpush.bf16.msrb.mxu2 %v1705_v59  ;;  %v1784_v55 = vld [vmem:[#allocation2 + $0x410] sm:$0xf]  ;;  %v1961_v56 = vld [vmem:[#allocation2 + $0x454] sm:$0xf0]  ;;  %v1952_v57 = vld [vmem:[#allocation2 + $0x414] sm:$0xf]  ;;  %v1345_v59 = vor.u32 %v1852_v48, %v1344_v46  ;;  %v1265_v0 = vor.u32 %v1833_v52, %v1264_v45  ;;  %v1269_v4 = vor.u32 %v1824_v53, %v1266_v54 }
  0x31   :  { %1030 = vmatpush.bf16.msrb.mxu3 %v1709_v60  ;;  %992 = vmatpush.bf16.msrb.mxu0 %v1625_v62  ;;  %v1349_v60 = vor.u32 %v1843_v49, %v1346_v50  ;;  %v1786_v61 = vld [vmem:[#allocation2 + $0x458] sm:$0xf0]  ;;  %v1272_v62 = vld [vmem:[#allocation2 + $0x18] sm:$0xf]  ;;  %v1834_v63 = vld [vmem:[#allocation2 + $0x5c] sm:$0xf0]  ;;  %v1785_v5 = vor.u32 %v1961_v56, %v1784_v55 }
  0x32   :  { %1005 = vmatpush.bf16.msrb.mxu1 %v1629_v2  ;;  %v1825_v1 = vld [vmem:[#allocation2 + $0x1c] sm:$0xf]  ;;  %v1274_v2 = vld [vmem:[#allocation2 + $0x60] sm:$0xf0]  ;;  %v1792_v3 = vld [vmem:[#allocation2 + $0x418] sm:$0xf]  ;;  %v1789_v9 = vor.u32 %v1952_v57, %v1786_v61  ;;  %v1273_v12 = vor.u32 %v1834_v63, %v1272_v62 }
  0x33   :  { %v1962_v6 = vld [vmem:[#allocation2 + $0x45c] sm:$0xf0]  ;;  %v1943_v11 = vld [vmem:[#allocation2 + $0x3c4] sm:$0xf0]  ;;  %v1277_v13 = vor.u32 %v1825_v1, %v1274_v2  ;;  %v1714_v15 = vld [vmem:[#allocation2 + $0x3c8] sm:$0xf0] }
  0x34   :  { %1018 = vmatpush.bf16.msrb.mxu2 %v1633_v7  ;;  %v1953_v7 = vld [vmem:[#allocation2 + $0x41c] sm:$0xf]  ;;  %v1793_v16 = vor.u32 %v1962_v6, %v1792_v3  ;;  %v1720_v18 = vld [vmem:[#allocation2 + $0x388] sm:$0xf]  ;;  %v1935_v21 = vld [vmem:[#allocation2 + $0x38c] sm:$0xf] }
  0x35   :  { %1031 = vmatpush.bf16.msrb.mxu3 %v1637_v8  ;;  %993 = vmatpush.bf16.msrb.mxu0 %v1553_v10  ;;  %v1794_v8 = vld [vmem:[#allocation2 + $0x460] sm:$0xf0]  ;;  %v1712_v10 = vld [vmem:[#allocation2 + $0x380] sm:$0xf]  ;;  %v1640_v24 = vld [vmem:[#allocation2 + $0x2f0] sm:$0xf] }
  0x36   :  { %1006 = vmatpush.bf16.msrb.mxu1 %v1557_v14  ;;  %v1934_v14 = vld [vmem:[#allocation2 + $0x384] sm:$0xf]  ;;  %v1797_v17 = vor.u32 %v1953_v7, %v1794_v8  ;;  %v1925_v25 = vld [vmem:[#allocation2 + $0x334] sm:$0xf0]  ;;  %v1642_v27 = vld [vmem:[#allocation2 + $0x338] sm:$0xf0] }
  0x37   :  { %v1717_v23 = vor.u32 %v1934_v14, %v1714_v15  ;;  %v1648_v30 = vld [vmem:[#allocation2 + $0x2f8] sm:$0xf]  ;;  %v1917_v33 = vld [vmem:[#allocation2 + $0x2fc] sm:$0xf]  ;;  %v1568_v36 = vld [vmem:[#allocation2 + $0x260] sm:$0xf] }
  0x38   :  { %1019 = vmatpush.bf16.msrb.mxu2 %v1561_v19  ;;  %v1713_v19 = vor.u32 %v1943_v11, %v1712_v10  ;;  %v1907_v37 = vld [vmem:[#allocation2 + $0x2a4] sm:$0xf0]  ;;  %v1570_v39 = vld [vmem:[#allocation2 + $0x2a8] sm:$0xf0]  ;;  %v1578_v46 = vld [vmem:[#allocation2 + $0x2b0] sm:$0xf0] }
  0x39   :  { %1032 = vmatpush.bf16.msrb.mxu3 %v1565_v20  ;;  %994 = vmatpush.bf16.msrb.mxu0 %v1481_v22  ;;  %v1944_v20 = vld [vmem:[#allocation2 + $0x3cc] sm:$0xf0]  ;;  %v1722_v22 = vld [vmem:[#allocation2 + $0x3d0] sm:$0xf0]  ;;  %v1576_v42 = vld [vmem:[#allocation2 + $0x268] sm:$0xf] }
  0x3a   :  { %1007 = vmatpush.bf16.msrb.mxu1 %v1485_v26  ;;  %v1916_v26 = vld [vmem:[#allocation2 + $0x2f4] sm:$0xf]  ;;  %v1721_v28 = vor.u32 %v1944_v20, %v1720_v18  ;;  %v1725_v29 = vor.u32 %v1935_v21, %v1722_v22  ;;  %v1899_v45 = vld [vmem:[#allocation2 + $0x26c] sm:$0xf]  ;;  %v1496_v48 = vld [vmem:[#allocation2 + $0x1d0] sm:$0xf] }
  0x3b   :  { %v1645_v35 = vor.u32 %v1916_v26, %v1642_v27  ;;  %v1889_v49 = vld [vmem:[#allocation2 + $0x214] sm:$0xf0]  ;;  %v1880_v50 = vld [vmem:[#allocation2 + $0x1d4] sm:$0xf]  ;;  %v1581_v53 = vor.u32 %v1899_v45, %v1578_v46  ;;  %v1890_v56 = vld [vmem:[#allocation2 + $0x21c] sm:$0xf0] }
  0x3c   :  { %1020 = vmatpush.bf16.msrb.mxu2 %v1489_v31  ;;  %v1641_v31 = vor.u32 %v1925_v25, %v1640_v24  ;;  %v1504_v54 = vld [vmem:[#allocation2 + $0x1d8] sm:$0xf]  ;;  %v1497_v55 = vor.u32 %v1889_v49, %v1496_v48  ;;  %v1881_v57 = vld [vmem:[#allocation2 + $0x1dc] sm:$0xf]  ;;  %v1424_v61 = vld [vmem:[#allocation2 + $0x140] sm:$0xf] }
  0x3d   :  { %1033 = vmatpush.bf16.msrb.mxu3 %v1493_v32  ;;  %995 = vmatpush.bf16.msrb.mxu0 %v1409_v34  ;;  %v1926_v32 = vld [vmem:[#allocation2 + $0x33c] sm:$0xf0]  ;;  %v1650_v34 = vld [vmem:[#allocation2 + $0x340] sm:$0xf0]  ;;  %v1871_v62 = vld [vmem:[#allocation2 + $0x184] sm:$0xf0]  ;;  %v1505_v1 = vor.u32 %v1890_v56, %v1504_v54 }
  0x3e   :  { %1008 = vmatpush.bf16.msrb.mxu1 %v1413_v38  ;;  %v1898_v38 = vld [vmem:[#allocation2 + $0x264] sm:$0xf]  ;;  %v1649_v40 = vor.u32 %v1926_v32, %v1648_v30  ;;  %v1653_v41 = vor.u32 %v1917_v33, %v1650_v34  ;;  %v1432_v3 = vld [vmem:[#allocation2 + $0x148] sm:$0xf]  ;;  %v1863_v6 = vld [vmem:[#allocation2 + $0x14c] sm:$0xf] }
  0x3f   :  { %v1862_v63 = vld [vmem:[#allocation2 + $0x144] sm:$0xf]  ;;  %v1434_v7 = vld [vmem:[#allocation2 + $0x190] sm:$0xf0]  ;;  %v1853_v10 = vld [vmem:[#allocation2 + $0xf4] sm:$0xf0] }
  0x40   :  { %1021 = vmatpush.bf16.msrb.mxu2 %v1417_v43  ;;  %v1569_v43 = vor.u32 %v1907_v37, %v1568_v36  ;;  %v1844_v11 = vld [vmem:[#allocation2 + $0xb4] sm:$0xf]  ;;  %v1437_v14 = vor.u32 %v1863_v6, %v1434_v7  ;;  %v1280_v15 = vld [vmem:[#allocation2 + $0x20] sm:$0xf]  ;;  %v1362_v20 = vld [vmem:[#allocation2 + $0x100] sm:$0xf0] }
  0x41   :  { %1034 = vmatpush.bf16.msrb.mxu3 %v1421_v44  ;;  %996 = vmatpush.bf16.msrb.mxu0 %v1337_v47  ;;  %v1908_v44 = vld [vmem:[#allocation2 + $0x2ac] sm:$0xf0]  ;;  %v1573_v47 = vor.u32 %v1898_v38, %v1570_v39  ;;  %v1854_v18 = vld [vmem:[#allocation2 + $0xfc] sm:$0xf0]  ;;  %v1835_v22 = vld [vmem:[#allocation2 + $0x64] sm:$0xf0] }
  0x42   :  { %1009 = vmatpush.bf16.msrb.mxu1 %v1341_v51  ;;  %v1498_v51 = vld [vmem:[#allocation2 + $0x218] sm:$0xf0]  ;;  %v1577_v52 = vor.u32 %v1908_v44, %v1576_v42  ;;  %v1282_v24 = vld [vmem:[#allocation2 + $0x68] sm:$0xf0]  ;;  %v1800_v25 = vld [vmem:[#allocation2 + $0x420] sm:$0xf]  ;;  %v1281_v33 = vor.u32 %v1835_v22, %v1280_v15 }
  0x43   :  { %v1963_v26 = vld [vmem:[#allocation2 + $0x464] sm:$0xf0]  ;;  %v1954_v27 = vld [vmem:[#allocation2 + $0x424] sm:$0xf]  ;;  %v1802_v30 = vld [vmem:[#allocation2 + $0x468] sm:$0xf0] }
  0x44   :  { %1022 = vmatpush.bf16.msrb.mxu2 %v1345_v59  ;;  %v1506_v59 = vld [vmem:[#allocation2 + $0x220] sm:$0xf0]  ;;  %v1836_v32 = vld [vmem:[#allocation2 + $0x6c] sm:$0xf0]  ;;  %v1827_v34 = vld [vmem:[#allocation2 + $0x2c] sm:$0xf]  ;;  %v1801_v38 = vor.u32 %v1963_v26, %v1800_v25  ;;  %v1805_v42 = vor.u32 %v1954_v27, %v1802_v30 }
  0x45   :  { %1035 = vmatpush.bf16.msrb.mxu3 %v1349_v60  ;;  %997 = vmatpush.bf16.msrb.mxu0 %v1265_v0  ;;  %v1501_v60 = vor.u32 %v1880_v50, %v1498_v51  ;;  %v1426_v0 = vld [vmem:[#allocation2 + $0x188] sm:$0xf0]  ;;  %v1509_v2 = vor.u32 %v1881_v57, %v1506_v59  ;;  %v1808_v36 = vld [vmem:[#allocation2 + $0x428] sm:$0xf]  ;;  %v1964_v39 = vld [vmem:[#allocation2 + $0x46c] sm:$0xf0] }
  0x46   :  { %1010 = vmatpush.bf16.msrb.mxu1 %v1269_v4  ;;  %v1425_v4 = vor.u32 %v1871_v62, %v1424_v61  ;;  %v1429_v8 = vor.u32 %v1862_v63, %v1426_v0  ;;  %v1945_v44 = vld [vmem:[#allocation2 + $0x3d4] sm:$0xf0]  ;;  %v1730_v48 = vld [vmem:[#allocation2 + $0x3d8] sm:$0xf0]  ;;  %v1809_v49 = vor.u32 %v1964_v39, %v1808_v36  ;;  %v1656_v57 = vld [vmem:[#allocation2 + $0x300] sm:$0xf] }
  0x47   :  { %v1736_v51 = vld [vmem:[#allocation2 + $0x398] sm:$0xf]  ;;  %v1937_v54 = vld [vmem:[#allocation2 + $0x39c] sm:$0xf]  ;;  %v1927_v59 = vld [vmem:[#allocation2 + $0x344] sm:$0xf0] }
  0x48   :  { %1023 = vmatpush.bf16.msrb.mxu2 %v1273_v12  ;;  %998 = vmatmul.bf16.vlgmr.msrb.gmra.mxu0 %v2052_v58  ;;  %v1354_v12 = vld [vmem:[#allocation2 + $0xf8] sm:$0xf0]  ;;  %v1658_v61 = vld [vmem:[#allocation2 + $0x348] sm:$0xf0]  ;;  %v1664_v0 = vld [vmem:[#allocation2 + $0x308] sm:$0xf] }
  0x49   :  { %1042 = vmatpush.bf16.msra.mxu0 %v1785_v5  ;;  %1036 = vmatpush.bf16.msrb.mxu3 %v1277_v13  ;;  %v1872_v5 = vld [vmem:[#allocation2 + $0x18c] sm:$0xf0]  ;;  %v1357_v21 = vor.u32 %v1844_v11, %v1354_v12  ;;  %v1909_v7 = vld [vmem:[#allocation2 + $0x2b4] sm:$0xf0]  ;;  %v1901_v15 = vld [vmem:[#allocation2 + $0x27c] sm:$0xf] }
  0x4a   :  { %1055 = vmatpush.bf16.msra.mxu1 %v1789_v9  ;;  %v1352_v9 = vld [vmem:[#allocation2 + $0xb0] sm:$0xf]  ;;  %v1433_v13 = vor.u32 %v1872_v5, %v1432_v3  ;;  %v1919_v3 = vld [vmem:[#allocation2 + $0x30c] sm:$0xf]  ;;  %v1592_v12 = vld [vmem:[#allocation2 + $0x278] sm:$0xf] }
  0x4b   :  { %1011 = vmatmul.bf16.vlgmr.msrb.gmra.mxu1 %v2052_v58  ;;  %1024 = vmatmul.bf16.vlgmr.msrb.gmra.mxu2 %v2052_v58  ;;  %v1584_v6 = vld [vmem:[#allocation2 + $0x270] sm:$0xf]  ;;  %v1883_v27 = vld [vmem:[#allocation2 + $0x1ec] sm:$0xf]  ;;  %v1448_v36 = vld [vmem:[#allocation2 + $0x158] sm:$0xf] }
  0x4c   :  { %1068 = vmatpush.bf16.msra.mxu2 %v1793_v16  ;;  %1037 = vmatmul.bf16.vlgmr.msrb.gmra.mxu3 %v2052_v58  ;;  %v1360_v16 = vld [vmem:[#allocation2 + $0xb8] sm:$0xf]  ;;  %v1892_v26 = vld [vmem:[#allocation2 + $0x22c] sm:$0xf0]  ;;  %v1865_v39 = vld [vmem:[#allocation2 + $0x15c] sm:$0xf] }
  0x4d   :  { %1081 = vmatpush.bf16.msra.mxu3 %v1797_v17  ;;  %1043 = vmatpush.bf16.msra.mxu0 %v1713_v19  ;;  %v1353_v17 = vor.u32 %v1853_v10, %v1352_v9  ;;  %v1845_v19 = vld [vmem:[#allocation2 + $0xbc] sm:$0xf]  ;;  %v1440_v30 = vld [vmem:[#allocation2 + $0x150] sm:$0xf]  ;;  %vm1203_vm0 = vcmask 1041408   ;;  %vm1205_vm1 = vcmask 1045508  }
  0x4e   :  { %1056 = vmatpush.bf16.msra.mxu1 %v1717_v23  ;;  %v1826_v23 = vld [vmem:[#allocation2 + $0x24] sm:$0xf]  ;;  %v1586_v9 = vld [vmem:[#allocation2 + $0x2b8] sm:$0xf0]  ;;  %vm1207_vm2 = vcmask 1043456   ;;  %s2025_s25 = smov [#allocation5]  }
  0x4f   :  { %v1285_v37 = vor.u32 %v1826_v23, %v1282_v24  ;;  %v1520_v24 = vld [vmem:[#allocation2 + $0x1e8] sm:$0xf]  ;;  %s1234_s26 = sshll.u32 %s2025_s25, 4  ;;  %s1236_s29 = sshll.u32 %s2100_s3, 4  ;;  %s1235_s26 = int_to_ptr.vmem [resolvable:$true] %s1234_s26  ;;  %s1237_s29 = int_to_ptr.hbm [resolvable:$true] %s1236_s29 }
  0x50   :  { %1069 = vmatpush.bf16.msra.mxu2 %v1721_v28  ;;  %v1361_v28 = vor.u32 %v1854_v18, %v1360_v16  ;;  %v1594_v16 = vld [vmem:[#allocation2 + $0x2c0] sm:$0xf0]  ;;  %v1512_v18 = vld [vmem:[#allocation2 + $0x1e0] sm:$0xf] }
  0x51   :  { %1082 = vmatpush.bf16.msra.mxu3 %v1725_v29  ;;  %1044 = vmatpush.bf16.msra.mxu0 %v1641_v31  ;;  %v1365_v29 = vor.u32 %v1845_v19, %v1362_v20  ;;  %v1288_v31 = vld [vmem:[#allocation2 + $0x28] sm:$0xf]  ;;  %v1882_v20 = vld [vmem:[#allocation2 + $0x1e4] sm:$0xf]  ;;  %v1597_v23 = vor.u32 %v1901_v15, %v1594_v16 }
  0x52   :  { %1057 = vmatpush.bf16.msra.mxu1 %v1645_v35  ;;  %v1290_v35 = vld [vmem:[#allocation2 + $0x70] sm:$0xf0]  ;;  %v1289_v45 = vor.u32 %v1836_v32, %v1288_v31  ;;  %v1891_v19 = vld [vmem:[#allocation2 + $0x224] sm:$0xf0]  ;;  %v1873_v31 = vld [vmem:[#allocation2 + $0x194] sm:$0xf0] }
  0x53   :  { %v1293_v46 = vor.u32 %v1827_v34, %v1290_v35  ;;  %v1513_v25 = vor.u32 %v1891_v19, %v1512_v18  ;;  %v1864_v32 = vld [vmem:[#allocation2 + $0x154] sm:$0xf]  ;;  %v1521_v34 = vor.u32 %v1892_v26, %v1520_v24  ;;  %v1929_v18 = vld [vmem:[#allocation2 + $0x354] sm:$0xf0]  ;;  %v1911_v24 = vld [vmem:[#allocation2 + $0x2c4] sm:$0xf0] }
  0x54   :  { %1070 = vmatpush.bf16.msra.mxu2 %v1649_v40  ;;  %v1955_v40 = vld [vmem:[#allocation2 + $0x42c] sm:$0xf]  ;;  %v1920_v19 = vld [vmem:[#allocation2 + $0x314] sm:$0xf] }
  0x55   :  { %1083 = vmatpush.bf16.msra.mxu3 %v1653_v41  ;;  %1045 = vmatpush.bf16.msra.mxu0 %v1569_v43  ;;  %v1810_v41 = vld [vmem:[#allocation2 + $0x470] sm:$0xf0]  ;;  %v1728_v43 = vld [vmem:[#allocation2 + $0x390] sm:$0xf]  ;;  %v1602_v26 = vld [vmem:[#allocation2 + $0x2c8] sm:$0xf0] }
  0x56   :  { %1058 = vmatpush.bf16.msra.mxu1 %v1573_v47  ;;  %v1936_v47 = vld [vmem:[#allocation2 + $0x394] sm:$0xf]  ;;  %v1813_v50 = vor.u32 %v1955_v40, %v1810_v41  ;;  %v1450_v40 = vld [vmem:[#allocation2 + $0x1a0] sm:$0xf0] }
  0x57   :  { %v1733_v56 = vor.u32 %v1936_v47, %v1730_v48  ;;  %v1453_v47 = vor.u32 %v1865_v39, %v1450_v40  ;;  %v1376_v48 = vld [vmem:[#allocation2 + $0xc8] sm:$0xf] }
  0x58   :  { %1071 = vmatpush.bf16.msra.mxu2 %v1577_v52  ;;  %v1729_v52 = vor.u32 %v1945_v44, %v1728_v43  ;;  %v1855_v43 = vld [vmem:[#allocation2 + $0x104] sm:$0xf0]  ;;  %v1846_v44 = vld [vmem:[#allocation2 + $0xc4] sm:$0xf] }
  0x59   :  { %1084 = vmatpush.bf16.msra.mxu3 %v1581_v53  ;;  %1046 = vmatpush.bf16.msra.mxu0 %v1497_v55  ;;  %v1946_v53 = vld [vmem:[#allocation2 + $0x3dc] sm:$0xf0]  ;;  %v1738_v55 = vld [vmem:[#allocation2 + $0x3e0] sm:$0xf0] }
  0x5a   :  { %1059 = vmatpush.bf16.msra.mxu1 %v1501_v60  ;;  %v1918_v60 = vld [vmem:[#allocation2 + $0x304] sm:$0xf]  ;;  %v1737_v62 = vor.u32 %v1946_v53, %v1736_v51  ;;  %v1741_v63 = vor.u32 %v1937_v54, %v1738_v55  ;;  %v1847_v51 = vld [vmem:[#allocation2 + $0xcc] sm:$0xf]  ;;  %v1296_v54 = vld [vmem:[#allocation2 + $0x30] sm:$0xf] }
  0x5b   :  { %v1661_v5 = vor.u32 %v1918_v60, %v1658_v61  ;;  %v1837_v55 = vld [vmem:[#allocation2 + $0x74] sm:$0xf0] }
  0x5c   :  { %1072 = vmatpush.bf16.msra.mxu2 %v1505_v1  ;;  %v1657_v1 = vor.u32 %v1927_v59, %v1656_v57  ;;  %v1298_v57 = vld [vmem:[#allocation2 + $0x78] sm:$0xf0]  ;;  %v1816_v59 = vld [vmem:[#allocation2 + $0x430] sm:$0xf]  ;;  %v1965_v60 = vld [vmem:[#allocation2 + $0x474] sm:$0xf0] }
  0x5d   :  { %1085 = vmatpush.bf16.msra.mxu3 %v1509_v2  ;;  %1047 = vmatpush.bf16.msra.mxu0 %v1425_v4  ;;  %v1928_v2 = vld [vmem:[#allocation2 + $0x34c] sm:$0xf0]  ;;  %v1666_v4 = vld [vmem:[#allocation2 + $0x350] sm:$0xf0] }
  0x5e   :  { %1060 = vmatpush.bf16.msra.mxu1 %v1429_v8  ;;  %v1900_v8 = vld [vmem:[#allocation2 + $0x274] sm:$0xf]  ;;  %v1665_v10 = vor.u32 %v1928_v2, %v1664_v0  ;;  %v1669_v11 = vor.u32 %v1919_v3, %v1666_v4  ;;  %v1818_v0 = vld [vmem:[#allocation2 + $0x478] sm:$0xf0]  ;;  %v1297_v2 = vor.u32 %v1837_v55, %v1296_v54  ;;  %v1838_v3 = vld [vmem:[#allocation2 + $0x7c] sm:$0xf0] }
  0x5f   :  { %v1829_v4 = vld [vmem:[#allocation2 + $0x3c] sm:$0xf] }
  0x60   :  { %1073 = vmatpush.bf16.msra.mxu2 %v1433_v13  ;;  %v1585_v13 = vor.u32 %v1909_v7, %v1584_v6  ;;  %v1817_v7 = vor.u32 %v1965_v60, %v1816_v59 }
  0x61   :  { %1086 = vmatpush.bf16.msra.mxu3 %v1437_v14  ;;  %1048 = vmatpush.bf16.msra.mxu0 %v1353_v17  ;;  %v1910_v14 = vld [vmem:[#allocation2 + $0x2bc] sm:$0xf0]  ;;  %v1589_v17 = vor.u32 %v1900_v8, %v1586_v9 }
  0x62   :  { %1061 = vmatpush.bf16.msra.mxu1 %v1357_v21  ;;  %v1514_v21 = vld [vmem:[#allocation2 + $0x228] sm:$0xf0]  ;;  %v1593_v22 = vor.u32 %v1910_v14, %v1592_v12  ;;  %v1744_v9 = vld [vmem:[#allocation2 + $0x3a0] sm:$0xf] }
  0x63   :  { %v1746_v14 = vld [vmem:[#allocation2 + $0x3e8] sm:$0xf0] }
  0x64   :  { %1074 = vmatpush.bf16.msra.mxu2 %v1361_v28  ;;  %v1522_v28 = vld [vmem:[#allocation2 + $0x230] sm:$0xf0] }
  0x65   :  { %1087 = vmatpush.bf16.msra.mxu3 %v1365_v29  ;;  %1049 = vmatpush.bf16.msra.mxu0 %v1281_v33  ;;  %v1517_v29 = vor.u32 %v1882_v20, %v1514_v21  ;;  %v1442_v33 = vld [vmem:[#allocation2 + $0x198] sm:$0xf0]  ;;  %v1525_v35 = vor.u32 %v1883_v27, %v1522_v28 }
  0x66   :  { %1062 = vmatpush.bf16.msra.mxu1 %v1285_v37  ;;  %v1441_v37 = vor.u32 %v1873_v31, %v1440_v30  ;;  %v1445_v41 = vor.u32 %v1864_v32, %v1442_v33  ;;  %v1674_v20 = vld [vmem:[#allocation2 + $0x358] sm:$0xf0]  ;;  %v1893_v30 = vld [vmem:[#allocation2 + $0x234] sm:$0xf0]  ;;  %v1884_v31 = vld [vmem:[#allocation2 + $0x1f4] sm:$0xf] }
  0x67   :  { %v1530_v32 = vld [vmem:[#allocation2 + $0x238] sm:$0xf0] }
  0x68   :  { %1075 = vmatpush.bf16.msra.mxu2 %v1289_v45  ;;  %1050 = vmatmul.bf16.vlgmr.msra.gmra.mxu0 %v2052_v58  ;;  %v1370_v45 = vld [vmem:[#allocation2 + $0x108] sm:$0xf0] }
  0x69   :  { %1094 = vmatpush.bf16.msrb.mxu0 %v1801_v38  ;;  %1088 = vmatpush.bf16.msra.mxu3 %v1293_v46  ;;  %v1874_v38 = vld [vmem:[#allocation2 + $0x19c] sm:$0xf0]  ;;  %v1373_v53 = vor.u32 %v1846_v44, %v1370_v45  ;;  %v1386_v44 = vld [vmem:[#allocation2 + $0x118] sm:$0xf0] }
  0x6a   :  { %1107 = vmatpush.bf16.msrb.mxu1 %v1805_v42  ;;  %v1368_v42 = vld [vmem:[#allocation2 + $0xc0] sm:$0xf]  ;;  %v1449_v46 = vor.u32 %v1874_v38, %v1448_v36  ;;  %v1875_v36 = vld [vmem:[#allocation2 + $0x1a4] sm:$0xf0]  ;;  %v1458_v38 = vld [vmem:[#allocation2 + $0x1a8] sm:$0xf0] }
  0x6b   :  { %1063 = vmatmul.bf16.vlgmr.msra.gmra.mxu1 %v2052_v58  ;;  %1076 = vmatmul.bf16.vlgmr.msra.gmra.mxu2 %v2052_v58 }
  0x6c   :  { %1120 = vmatpush.bf16.msrb.mxu2 %v1809_v49  ;;  %1089 = vmatmul.bf16.vlgmr.msra.gmra.mxu3 %v2052_v58  ;;  %v1369_v49 = vor.u32 %v1855_v43, %v1368_v42  ;;  %v1857_v42 = vld [vmem:[#allocation2 + $0x114] sm:$0xf0]  ;;  %v1848_v43 = vld [vmem:[#allocation2 + $0xd4] sm:$0xf] }
  0x6d   :  { %1133 = vmatpush.bf16.msrb.mxu3 %v1813_v50  ;;  %1095 = vmatpush.bf16.msrb.mxu0 %v1729_v52  ;;  %v1856_v50 = vld [vmem:[#allocation2 + $0x10c] sm:$0xf0]  ;;  %v1378_v52 = vld [vmem:[#allocation2 + $0x110] sm:$0xf0] }
  0x6e   :  { %1108 = vmatpush.bf16.msrb.mxu1 %v1733_v56  ;;  %v1828_v56 = vld [vmem:[#allocation2 + $0x34] sm:$0xf]  ;;  %v1377_v61 = vor.u32 %v1856_v50, %v1376_v48  ;;  %v1839_v48 = vld [vmem:[#allocation2 + $0x84] sm:$0xf0]  ;;  %v1314_v50 = vld [vmem:[#allocation2 + $0x88] sm:$0xf0] }
  0x6f   :  { %v1301_v6 = vor.u32 %v1828_v56, %v1298_v57 }
  0x70   :  { %1121 = vmatpush.bf16.msrb.mxu2 %v1737_v62  ;;  %v1381_v62 = vor.u32 %v1847_v51, %v1378_v52 }
  0x71   :  { %1134 = vmatpush.bf16.msrb.mxu3 %v1741_v63  ;;  %1096 = vmatpush.bf16.msrb.mxu0 %v1657_v1  ;;  %v1956_v63 = vld [vmem:[#allocation2 + $0x434] sm:$0xf]  ;;  %v1304_v1 = vld [vmem:[#allocation2 + $0x38] sm:$0xf] }
  0x72   :  { %1109 = vmatpush.bf16.msrb.mxu1 %v1661_v5  ;;  %v1306_v5 = vld [vmem:[#allocation2 + $0x80] sm:$0xf0]  ;;  %v1821_v8 = vor.u32 %v1956_v63, %v1818_v0 }
  0x73   :  { %v1309_v12 = vor.u32 %v1829_v4, %v1306_v5 }
  0x74   :  { %1122 = vmatpush.bf16.msrb.mxu2 %v1665_v10  ;;  %v1947_v10 = vld [vmem:[#allocation2 + $0x3e4] sm:$0xf0] }
  0x75   :  { %1135 = vmatpush.bf16.msrb.mxu3 %v1669_v11  ;;  %1097 = vmatpush.bf16.msrb.mxu0 %v1585_v13  ;;  %v1305_v11 = vor.u32 %v1838_v3, %v1304_v1  ;;  %v1938_v13 = vld [vmem:[#allocation2 + $0x3a4] sm:$0xf]  ;;  %v1745_v15 = vor.u32 %v1947_v10, %v1744_v9 }
  0x76   :  { %1110 = vmatpush.bf16.msrb.mxu1 %v1589_v17  ;;  %v1749_v16 = vor.u32 %v1938_v13, %v1746_v14  ;;  %v1672_v17 = vld [vmem:[#allocation2 + $0x310] sm:$0xf] }
  0x77   :  { %v1673_v21 = vor.u32 %v1929_v18, %v1672_v17 }
  0x78   :  { %1123 = vmatpush.bf16.msrb.mxu2 %v1593_v22  ;;  %v1677_v22 = vor.u32 %v1920_v19, %v1674_v20 }
  0x79   :  { %1136 = vmatpush.bf16.msrb.mxu3 %v1597_v23  ;;  %1098 = vmatpush.bf16.msrb.mxu0 %v1513_v25  ;;  %v1600_v23 = vld [vmem:[#allocation2 + $0x280] sm:$0xf]  ;;  %v1902_v25 = vld [vmem:[#allocation2 + $0x284] sm:$0xf] }
  0x7a   :  { %1111 = vmatpush.bf16.msrb.mxu1 %v1517_v29  ;;  %v1601_v27 = vor.u32 %v1911_v24, %v1600_v23  ;;  %v1605_v28 = vor.u32 %v1902_v25, %v1602_v26  ;;  %v1528_v29 = vld [vmem:[#allocation2 + $0x1f0] sm:$0xf] }
  0x7b   :  { %v1529_v33 = vor.u32 %v1893_v30, %v1528_v29 }
  0x7c   :  { %1124 = vmatpush.bf16.msrb.mxu2 %v1521_v34  ;;  %v1533_v34 = vor.u32 %v1884_v31, %v1530_v32 }
  0x7d   :  { %1137 = vmatpush.bf16.msrb.mxu3 %v1525_v35  ;;  %1099 = vmatpush.bf16.msrb.mxu0 %v1441_v37  ;;  %v1456_v35 = vld [vmem:[#allocation2 + $0x160] sm:$0xf]  ;;  %v1866_v37 = vld [vmem:[#allocation2 + $0x164] sm:$0xf] }
  0x7e   :  { %1112 = vmatpush.bf16.msrb.mxu1 %v1445_v41  ;;  %v1457_v39 = vor.u32 %v1875_v36, %v1456_v35  ;;  %v1461_v40 = vor.u32 %v1866_v37, %v1458_v38  ;;  %v1384_v41 = vld [vmem:[#allocation2 + $0xd0] sm:$0xf] }
  0x7f   :  { %v1385_v45 = vor.u32 %v1857_v42, %v1384_v41 }
  0x80   :  { %1125 = vmatpush.bf16.msrb.mxu2 %v1449_v46  ;;  %v1389_v46 = vor.u32 %v1848_v43, %v1386_v44 }
  0x81   :  { %1138 = vmatpush.bf16.msrb.mxu3 %v1453_v47  ;;  %1100 = vmatpush.bf16.msrb.mxu0 %v1369_v49  ;;  %v1312_v47 = vld [vmem:[#allocation2 + $0x40] sm:$0xf]  ;;  %v1830_v49 = vld [vmem:[#allocation2 + $0x44] sm:$0xf] }
  0x82   :  { %1113 = vmatpush.bf16.msrb.mxu1 %v1373_v53  ;;  %v1313_v51 = vor.u32 %v1839_v48, %v1312_v47  ;;  %v1317_v52 = vor.u32 %v1830_v49, %v1314_v50  ;;  %v176_v53 = vld [vmem:[%s2099_s2] sm:$0xff] }
  0x83   :  { %v183_v54 = vperm.slane %v176_v53, 1  ;;  %v182_v57 = vperm.slane %v176_v53, 0  ;;  %v184_v60 = vperm.slane %v176_v53, 2  ;;  %v188_v17 = vperm.slane %v176_v53, 6 }
  0x84   :  { %1126 = vmatpush.bf16.msrb.mxu2 %v1377_v61  ;;  %v185_v61 = vperm.slane %v176_v53, 3  ;;  %v189_v18 = vperm.slane %v176_v53, 7 }
  0x85   :  { %1139 = vmatpush.bf16.msrb.mxu3 %v1381_v62  ;;  %1101 = vmatpush.bf16.msrb.mxu0 %v1297_v2 }
  0x86   :  { %1114 = vmatpush.bf16.msrb.mxu1 %v1301_v6 }
  0x88   :  { %1127 = vmatpush.bf16.msrb.mxu2 %v1305_v11  ;;  %1102 = vmatmul.bf16.vlgmr.msrb.gmra.mxu0 %v2052_v58 }
  0x89   :  { %1146 = vmatpush.bf16.msra.mxu0 %v1817_v7  ;;  %1140 = vmatpush.bf16.msrb.mxu3 %v1309_v12  ;;  %v187_v12 = vperm.slane %v176_v53, 5 }
  0x8a   :  { %1159 = vmatpush.bf16.msra.mxu1 %v1821_v8 }
  0x8b   :  { %1115 = vmatmul.bf16.vlgmr.msrb.gmra.mxu1 %v2052_v58  ;;  %1128 = vmatmul.bf16.vlgmr.msrb.gmra.mxu2 %v2052_v58 }
  0x8c   :  { %1141 = vmatmul.bf16.vlgmr.msrb.gmra.mxu3 %v2052_v58 }
  0x8d   :  { %1147 = vmatpush.bf16.msra.mxu0 %v1745_v15  ;;  %v186_v15 = vperm.slane %v176_v53, 4 }
  0x8e   :  { %1160 = vmatpush.bf16.msra.mxu1 %v1749_v16 }
  0x91   :  { %1148 = vmatpush.bf16.msra.mxu0 %v1673_v21 }
  0x92   :  { %1161 = vmatpush.bf16.msra.mxu1 %v1677_v22 }
  0x95   :  { %1149 = vmatpush.bf16.msra.mxu0 %v1601_v27 }
  0x96   :  { %1162 = vmatpush.bf16.msra.mxu1 %v1605_v28 }
  0x99   :  { %1150 = vmatpush.bf16.msra.mxu0 %v1529_v33 }
  0x9a   :  { %1163 = vmatpush.bf16.msra.mxu1 %v1533_v34  ;;  %v177_v34 = vld [vmem:[%s2099_s2 + $0x8] sm:$0xff] }
  0x9b   :  { %v191_v35 = vperm.slane %v177_v34, 1  ;;  %v190_v38 = vperm.slane %v177_v34, 0  ;;  %v193_v41 = vperm.slane %v177_v34, 3 }
  0x9d   :  { %1151 = vmatpush.bf16.msra.mxu0 %v1457_v39 }
  0x9e   :  { %1164 = vmatpush.bf16.msra.mxu1 %v1461_v40  ;;  %v192_v40 = vperm.slane %v177_v34, 2 }
  0xa1   :  { %1152 = vmatpush.bf16.msra.mxu0 %v1385_v45 }
  0xa2   :  { %1165 = vmatpush.bf16.msra.mxu1 %v1389_v46 }
  0xa5   :  { %1153 = vmatpush.bf16.msra.mxu0 %v1313_v51  ;;  %v947_v56 = vpop.f32.mrf.mxu0 }
  0xa6   :  { %1166 = vmatpush.bf16.msra.mxu1 %v1317_v52  ;;  %v948_v62 = vadd.f32 %v947_v56, %v182_v57 }
  0xa8   :  { %1154 = vmatmul.bf16.vlgmr.msra.gmra.mxu0 %v2052_v58  ;;  %v960_v55 = vpop.f32.mrf.mxu1 }
  0xa9   :  { %1167 = vmatmul.bf16.vlgmr.msra.gmra.mxu1 %v2052_v58  ;;  %v961_v59 = vadd.f32 %v960_v55, %v183_v54 }
  0xab   :  { %v1190_v63 = vrot.slane %v961_v59, 6  ;;  %v195_v59 = vperm.slane %v177_v34, 5 }
  0xad   :  { %v949_v4 = vpop.f32.mrf.mxu0  ;;  %v1204_v5 = vsel %vm1203_vm0, %v948_v62, %v1190_v63  ;;  %v196_v63 = vperm.slane %v177_v34, 6 }
  0xae   :  { %v973_v0 = vpop.f32.mrf.mxu2 }
  0xaf   :  { %v986_v1 = vpop.f32.mrf.mxu3  ;;  %v974_v2 = vadd.f32 %v973_v0, %v184_v60  ;;  %v197_v0 = vperm.slane %v177_v34, 7 }
  0xb0   :  { %v987_v3 = vadd.f32 %v986_v1, %v185_v61  ;;  %v962_v58 = vpop.f32.mrf.mxu1  ;;  %v194_v61 = vperm.slane %v177_v34, 4 }
  0xb1   :  { %v1191_v6 = vrot.slane %v974_v2, 4 }
  0xb2   :  { %v1192_v7 = vrot.slane %v987_v3, 2 }
  0xb4   :  { %v1206_v8 = vsel %vm1205_vm1, %v1191_v6, %v1192_v7 }
  0xb5   :  { %v1208_v9 = vsel %vm1207_vm2, %v1204_v5, %v1206_v8 }
  0xb6   :  { %1224 = vst [vmem:[#allocation5] sm:$0xff] %v1208_v9  ;;  %v975_v10 = vpop.f32.mrf.mxu2 }
  0xb7   :  { %v988_v11 = vpop.f32.mrf.mxu3 }
  0xc5   :  { %v999_v14 = vpop.f32.mrf.mxu0 }
  0xc6   :  { %v1000_v19 = vadd.f32 %v999_v14, %v186_v15  ;;  %v178_v15 = vld [vmem:[%s2099_s2 + $0x10] sm:$0x3] }
  0xc8   :  { %v1012_v13 = vpop.f32.mrf.mxu1 }
  0xc9   :  { %v1013_v16 = vadd.f32 %v1012_v13, %v187_v12 }
  0xcb   :  { %v1193_v20 = vrot.slane %v1013_v16, 6  ;;  %v199_v16 = vperm.slane %v178_v15, 1 }
  0xcd   :  { %v1001_v25 = vpop.f32.mrf.mxu0  ;;  %v1209_v27 = vsel %vm1203_vm0, %v1000_v19, %v1193_v20 }
  0xce   :  { %v1025_v21 = vpop.f32.mrf.mxu2 }
  0xcf   :  { %v1038_v22 = vpop.f32.mrf.mxu3  ;;  %v1026_v23 = vadd.f32 %v1025_v21, %v188_v17  ;;  %v198_v17 = vperm.slane %v178_v15, 0 }
  0xd0   :  { %v1039_v24 = vadd.f32 %v1038_v22, %v189_v18  ;;  %v1014_v26 = vpop.f32.mrf.mxu1 }
  0xd1   :  { %v1194_v28 = vrot.slane %v1026_v23, 4 }
  0xd2   :  { %v1195_v29 = vrot.slane %v1039_v24, 2 }
  0xd4   :  { %v1210_v30 = vsel %vm1205_vm1, %v1194_v28, %v1195_v29 }
  0xd5   :  { %v1211_v31 = vsel %vm1207_vm2, %v1209_v27, %v1210_v30 }
  0xd6   :  { %1225 = vst [vmem:[#allocation5 + $0x8] sm:$0xff] %v1211_v31  ;;  %v1027_v32 = vpop.f32.mrf.mxu2 }
  0xd7   :  { %v1040_v33 = vpop.f32.mrf.mxu3 }
  0xe5   :  { %v1051_v37 = vpop.f32.mrf.mxu0 }
  0xe6   :  { %v1052_v42 = vadd.f32 %v1051_v37, %v190_v38 }
  0xe8   :  { %v1064_v36 = vpop.f32.mrf.mxu1 }
  0xe9   :  { %v1065_v39 = vadd.f32 %v1064_v36, %v191_v35 }
  0xeb   :  { %v1196_v43 = vrot.slane %v1065_v39, 6 }
  0xed   :  { %v1053_v48 = vpop.f32.mrf.mxu0  ;;  %v1212_v50 = vsel %vm1203_vm0, %v1052_v42, %v1196_v43 }
  0xee   :  { %v1077_v44 = vpop.f32.mrf.mxu2 }
  0xef   :  { %v1090_v45 = vpop.f32.mrf.mxu3  ;;  %v1078_v46 = vadd.f32 %v1077_v44, %v192_v40 }
  0xf0   :  { %v1091_v47 = vadd.f32 %v1090_v45, %v193_v41  ;;  %v1066_v49 = vpop.f32.mrf.mxu1 }
  0xf1   :  { %v1197_v51 = vrot.slane %v1078_v46, 4 }
  0xf2   :  { %v1198_v52 = vrot.slane %v1091_v47, 2 }
  0xf4   :  { %v1213_v53 = vsel %vm1205_vm1, %v1197_v51, %v1198_v52 }
  0xf5   :  { %v1214_v54 = vsel %vm1207_vm2, %v1212_v50, %v1213_v53 }
  0xf6   :  { %1226 = vst [vmem:[#allocation5 + $0x10] sm:$0xff] %v1214_v54  ;;  %v1079_v55 = vpop.f32.mrf.mxu2 }
  0xf7   :  { %v1092_v56 = vpop.f32.mrf.mxu3 }
 0x105   :  { %v1103_v57 = vpop.f32.mrf.mxu0 }
 0x106   :  { %v1104_v1 = vadd.f32 %v1103_v57, %v194_v61 }
 0x108   :  { %v1116_v60 = vpop.f32.mrf.mxu1 }
 0x109   :  { %v1117_v62 = vadd.f32 %v1116_v60, %v195_v59 }
 0x10b   :  { %v1199_v2 = vrot.slane %v1117_v62, 6 }
 0x10d   :  { %v1105_v4 = vpop.f32.mrf.mxu0  ;;  %v1215_v9 = vsel %vm1203_vm0, %v1104_v1, %v1199_v2 }
 0x10e   :  { %v1129_v3 = vpop.f32.mrf.mxu2 }
 0x10f   :  { %v1130_v58 = vadd.f32 %v1129_v3, %v196_v63  ;;  %v1142_v5 = vpop.f32.mrf.mxu3 }
 0x110   :  { %v1118_v6 = vpop.f32.mrf.mxu1  ;;  %v1143_v7 = vadd.f32 %v1142_v5, %v197_v0 }
 0x111   :  { %v1200_v8 = vrot.slane %v1130_v58, 4 }
 0x112   :  { %v1201_v10 = vrot.slane %v1143_v7, 2 }
 0x114   :  { %v1216_v11 = vsel %vm1205_vm1, %v1200_v8, %v1201_v10 }
 0x115   :  { %v1217_v12 = vsel %vm1207_vm2, %v1215_v9, %v1216_v11 }
 0x116   :  { %1227 = vst [vmem:[#allocation5 + $0x18] sm:$0xff] %v1217_v12  ;;  %v1131_v13 = vpop.f32.mrf.mxu2 }
 0x117   :  { %v1144_v14 = vpop.f32.mrf.mxu3 }
 0x125   :  { %v1155_v18 = vpop.f32.mrf.mxu0 }
 0x126   :  { %v1168_v19 = vpop.f32.mrf.mxu1  ;;  %v1156_v21 = vadd.f32 %v1155_v18, %v198_v17 }
 0x127   :  { %v1169_v20 = vadd.f32 %v1168_v19, %v199_v16 }
 0x129   :  { %v1202_v22 = vrot.slane %v1169_v20, 6 }
 0x12b   :  { %v1218_v23 = vsel %vm1203_vm0, %v1156_v21, %v1202_v22 }
 0x12c   :  { %1228 = vst [vmem:[#allocation5 + $0x20] sm:$0xf] %v1218_v23 }
 0x12d   :  { %v1157_v24 = vpop.f32.mrf.mxu0  ;;  %1239 = dma.vmem_to_hbm [thread:$0]  %s1235_s26, 576, %s1237_s29, [#allocation4]  }
 0x12e   :  { %v1170_v25 = vpop.f32.mrf.mxu1 }
 0x12f   :  { %2020 = dma.done.wait [#allocation4], 576  }
 0x130   :  { %2021 = vsyncadd [#allocation4], 4294966720 }
 0x131   :  { %1244 = vsyncpa [#allocation3], 1 }
 0x132   :  { %1245 = vsyncpa [#allocation4], 1 }

</bundles_post_ra>
